<compile_context>
chip_gen: v7x
topology: tpu7x:2x2x1
jax: 0.10.0
libtpu: 0.0.40
codegen_flags: <defaults>
</compile_context>

<pallas_src>
import jax
import jax.numpy as jnp
from jax.experimental import pallas as pl
from jax.experimental.pallas import tpu as pltpu

_LANES = 128
_ACC_ROWS = 8            # accumulator tile sublanes (one f32 vreg)
_ROW_ALIGN = 16          # row alignment; also covers the bf16 (16,128) tile
_MAX_BLOCK_ROWS = 2048   # 2048*128*4B = 1 MiB f32 block per input
_PAD_LOGIT = -1e30       # finite: max(x,0)=0, x*0=0, log1p(exp(-|x|))=0


def _bce_sum_kernel(x_ref, y_ref, o_ref, acc_ref):
    b = pl.program_id(1)

    @pl.when(b == 0)
    def _():
        acc_ref[...] = jnp.zeros_like(acc_ref)

    x = x_ref[...]
    y = y_ref[...].astype(jnp.float32)

    # Numerically stable BCE-with-logits (matches PyTorch):
    #   max(x, 0) - x*y + log1p(exp(-|x|))
    loss = jnp.maximum(x, 0.0) - x * y + jnp.log1p(jnp.exp(-jnp.abs(x)))

    # Fold the block down to one (8, 128) per-lane partial-sum tile (pure VALU
    # adds; the single XLU cross-lane reduction happens once, in the wrapper).
    rows = loss.shape[0]
    acc_ref[...] += jnp.sum(
        loss.reshape(rows // _ACC_ROWS, _ACC_ROWS, _LANES), axis=0
    )

    @pl.when(b == pl.num_programs(1) - 1)
    def _():
        o_ref[...] = acc_ref[...]


def cross_entropy_loss(y_pred, y_true):
    """Pallas TPU implementation of libauc CrossEntropyLoss.forward.

    Equivalent to F.binary_cross_entropy_with_logits(y_pred.reshape(-1, 1),
    y_true.reshape(-1, 1).float()) with mean reduction.  Returns a scalar f32.
    """
    x = jnp.reshape(y_pred, (-1,)).astype(jnp.float32)

    y_true = jnp.asarray(y_true)
    # Integer / bool labels are exact in bf16 -> halve the target HBM stream.
    if jnp.issubdtype(y_true.dtype, jnp.floating):
        y_dtype = jnp.float32
    else:
        y_dtype = jnp.bfloat16
    y = jnp.reshape(y_true, (-1,)).astype(y_dtype)

    n = x.shape[0]
    assert y.shape[0] == n, "y_pred and y_true must have the same #elements"

    # Tiling: rows of 128 lanes, aligned to 16 rows, blocks of <=2048 rows.
    rows = pl.cdiv(n, _LANES)
    rows = pl.cdiv(rows, _ROW_ALIGN) * _ROW_ALIGN
    block_rows = min(_MAX_BLOCK_ROWS, rows)
    num_blocks = pl.cdiv(rows, block_rows)

    # Leading "parallel" axis -> megacore sharding on multi-TC chips (v7x).
    num_chunks = 2 if num_blocks >= 2 else 1
    num_blocks = pl.cdiv(num_blocks, num_chunks) * num_chunks
    blocks_per_chunk = num_blocks // num_chunks
    padded_rows = num_blocks * block_rows
    n_total = padded_rows * _LANES

    # Pad logits with a large finite negative and targets with 0 so the padded
    # tail contributes exactly 0 loss -> no in-kernel masking needed.
    x = jnp.pad(x, (0, n_total - n), constant_values=_PAD_LOGIT)
    y = jnp.pad(y, (0, n_total - n), constant_values=0)
    x = x.reshape(padded_rows, _LANES)
    y = y.reshape(padded_rows, _LANES)

    in_map = lambda c, b: (c * blocks_per_chunk + b, 0)

    partials = pl.pallas_call(
        _bce_sum_kernel,
        out_shape=jax.ShapeDtypeStruct(
            (num_chunks * _ACC_ROWS, _LANES), jnp.float32
        ),
        grid_spec=pltpu.PrefetchScalarGridSpec(
            num_scalar_prefetch=0,
            grid=(num_chunks, blocks_per_chunk),
            in_specs=[
                pl.BlockSpec((block_rows, _LANES), in_map),
                pl.BlockSpec((block_rows, _LANES), in_map),
            ],
            out_specs=pl.BlockSpec((_ACC_ROWS, _LANES), lambda c, b: (c, 0)),
            scratch_shapes=[pltpu.VMEM((_ACC_ROWS, _LANES), jnp.float32)],
        ),
        compiler_params=pltpu.CompilerParams(
            dimension_semantics=("parallel", "arbitrary"),
        ),
    )(x, y)

    # Tiny final cross-lane reduction + mean in plain JAX.
    return jnp.sum(partials) / jnp.float32(n)


def _reference(y_pred, y_true):
    x = jnp.reshape(y_pred, (-1,)).astype(jnp.float32)
    y = jnp.reshape(y_true, (-1,)).astype(jnp.float32)
    loss = jnp.maximum(x, 0.0) - x * y + jnp.log1p(jnp.exp(-jnp.abs(x)))
    return jnp.mean(loss)


if __name__ == "__main__":
    key = jax.random.PRNGKey(0)
    k1, k2, k3, k4 = jax.random.split(key, 4)

    # Matches the module docstring example: preds (32, 1), integer targets.
    preds = jax.random.normal(k1, (32, 1), dtype=jnp.float32)
    target = jax.random.randint(k2, (32,), 0, 2).astype(jnp.int32)

    loss = jax.jit(cross_entropy_loss)(preds, target)
    jax.block_until_ready(loss)
    ref = _reference(preds, target)
    assert jnp.allclose(loss, ref, rtol=1e-5, atol=1e-6), (loss, ref)

    # Larger case: exercises multi-block grid, megacore split and the float
    # (soft-label) target path.
    n_big = 300_000
    preds2 = jax.random.normal(k3, (n_big, 1), dtype=jnp.float32)
    target2 = jax.random.uniform(k4, (n_big,), dtype=jnp.float32)
    loss2 = jax.jit(cross_entropy_loss)(preds2, target2)
    jax.block_until_ready(loss2)
    ref2 = _reference(preds2, target2)
    assert jnp.allclose(loss2, ref2, rtol=1e-4, atol=1e-6), (loss2, ref2)

    print("KERNEL_OK")
</pallas_src>

<mosaic_0001>
module attributes {stable_mosaic.version = 11 : i64} {
  func.func @_bce_sum_kernel(%arg0: i32, %arg1: i32, %arg2: memref<16x128xf32, #tpu.memory_space<vmem>>, %arg3: memref<16x128xbf16, #tpu.memory_space<vmem>>, %arg4: memref<8x128xf32, #tpu.memory_space<vmem>>, %arg5: memref<8x128xf32, #tpu.memory_space<vmem>>) attributes {dimension_semantics = [#tpu.dimension_semantics<parallel>, #tpu.dimension_semantics<arbitrary>], iteration_bounds = array<i64: 1, 1>, scalar_prefetch = 0 : i64, scratch_operands = 1 : i64, tpu.core_type = #tpu.core_type<tc>, window_params = [{transform_indices = @transform_0, window_bounds = array<i64: 16, 128>}, {transform_indices = @transform_1, window_bounds = array<i64: 16, 128>}, {transform_indices = @transform_2, window_bounds = array<i64: 8, 128>}]} {
    %c0_i32 = arith.constant 0 : i32
    %0 = arith.cmpi eq, %arg1, %c0_i32 : i32
    %1 = arith.extui %0 : i1 to i32
    %c0_i32_0 = arith.constant 0 : i32
    %2 = arith.cmpi ne, %1, %c0_i32_0 : i32
    scf.if %2 {
      %cst_12 = arith.constant 0.000000e+00 : f32
      %24 = vector.broadcast %cst_12 : f32 to vector<8x128xf32>
      %c0_13 = arith.constant 0 : index
      %c0_14 = arith.constant 0 : index
      %25 = vector.load %arg5[%c0_13, %c0_14] : memref<8x128xf32, #tpu.memory_space<vmem>>, vector<8x128xf32>
      tpu.vector_store %arg5[%c0_13, %c0_14], %24 {strides = array<i32>} : memref<8x128xf32, #tpu.memory_space<vmem>>, vector<8x128xf32>,
    } else {
    }
    %c0 = arith.constant 0 : index
    %c0_1 = arith.constant 0 : index
    %3 = vector.load %arg2[%c0, %c0_1] : memref<16x128xf32, #tpu.memory_space<vmem>>, vector<16x128xf32>
    %c0_2 = arith.constant 0 : index
    %c0_3 = arith.constant 0 : index
    %4 = vector.load %arg3[%c0_2, %c0_3] : memref<16x128xbf16, #tpu.memory_space<vmem>>, vector<16x128xbf16>
    %5 = arith.extf %4 : vector<16x128xbf16> to vector<16x128xf32>
    %cst = arith.constant 0.000000e+00 : f32
    %6 = vector.broadcast %cst : f32 to vector<16x128xf32>
    %7 = arith.maximumf %3, %6 : vector<16x128xf32>
    %8 = arith.mulf %3, %5 : vector<16x128xf32>
    %9 = arith.subf %7, %8 : vector<16x128xf32>
    %10 = math.absf %3 : vector<16x128xf32>
    %cst_4 = arith.constant 0.000000e+00 : f32
    %11 = vector.broadcast %cst_4 : f32 to vector<16x128xf32>
    %12 = arith.subf %11, %10 : vector<16x128xf32>
    %13 = math.exp %12 : vector<16x128xf32>
    %14 = math.log1p %13 : vector<16x128xf32>
    %15 = arith.addf %9, %14 : vector<16x128xf32>
    %c0_5 = arith.constant 0 : index
    %c0_6 = arith.constant 0 : index
    %16 = vector.load %arg5[%c0_5, %c0_6] : memref<8x128xf32, #tpu.memory_space<vmem>>, vector<8x128xf32>
    %17 = vector.shape_cast %15 : vector<16x128xf32> to vector<2x8x128xf32>
    %cst_7 = arith.constant dense<0.000000e+00> : vector<8x128xf32>
    %18 = vector.multi_reduction <add>, %17, %cst_7 [0] : vector<2x8x128xf32> to vector<8x128xf32>
    %19 = arith.addf %16, %18 : vector<8x128xf32>
    %c0_8 = arith.constant 0 : index
    %c0_9 = arith.constant 0 : index
    %20 = vector.load %arg5[%c0_8, %c0_9] : memref<8x128xf32, #tpu.memory_space<vmem>>, vector<8x128xf32>
    tpu.vector_store %arg5[%c0_8, %c0_9], %19 {strides = array<i32>} : memref<8x128xf32, #tpu.memory_space<vmem>>, vector<8x128xf32>,
    %c0_i32_10 = arith.constant 0 : i32
    %21 = arith.cmpi eq, %arg1, %c0_i32_10 : i32
    %22 = arith.extui %21 : i1 to i32
    %c0_i32_11 = arith.constant 0 : i32
    %23 = arith.cmpi ne, %22, %c0_i32_11 : i32
    scf.if %23 {
      %c0_12 = arith.constant 0 : index
      %c0_13 = arith.constant 0 : index
      %24 = vector.load %arg5[%c0_12, %c0_13] : memref<8x128xf32, #tpu.memory_space<vmem>>, vector<8x128xf32>
      %c0_14 = arith.constant 0 : index
      %c0_15 = arith.constant 0 : index
      %25 = vector.load %arg4[%c0_14, %c0_15] : memref<8x128xf32, #tpu.memory_space<vmem>>, vector<8x128xf32>
      tpu.vector_store %arg4[%c0_14, %c0_15], %24 {strides = array<i32>} : memref<8x128xf32, #tpu.memory_space<vmem>>, vector<8x128xf32>,
    } else {
    }
    return
  }
  func.func @transform_0(%arg0: i32, %arg1: i32) -> (i32, i32) {
    %c1_i32 = arith.constant 1 : i32
    %0 = arith.muli %arg0, %c1_i32 : i32
    %1 = arith.addi %0, %arg1 : i32
    %c0_i32 = arith.constant 0 : i32
    %c0_i32_0 = arith.constant 0 : i32
    return %1, %c0_i32 : i32, i32
  }
  func.func @transform_1(%arg0: i32, %arg1: i32) -> (i32, i32) {
    %c1_i32 = arith.constant 1 : i32
    %0 = arith.muli %arg0, %c1_i32 : i32
    %1 = arith.addi %0, %arg1 : i32
    %c0_i32 = arith.constant 0 : i32
    %c0_i32_0 = arith.constant 0 : i32
    return %1, %c0_i32 : i32, i32
  }
  func.func @transform_2(%arg0: i32, %arg1: i32) -> (i32, i32) {
    %c0_i32 = arith.constant 0 : i32
    %c0_i32_0 = arith.constant 0 : i32
    return %arg0, %c0_i32 : i32, i32
  }
}

</mosaic_0001>

<bundles_post_ra>
// kernel: cross_entropy_loss.1
= control target key start
LH: loop header
LB: loop body
LE: loop exit
PB: predicated region body
PF: predicated region fallthrough
CT: control target
= control target key end

     0   :  { %s164_s0 = inlined_call_operand.vmem [shape: f32[16,128], index: 0, kind: input, shape index: {}]   ;;  %s165_s1 = inlined_call_operand.vmem [shape: bf16[16,128], index: 1, kind: input, shape index: {}]   ;;  %s166_s2 = inlined_call_operand.vmem [shape: f32[8,128], index: 2, kind: output, shape index: {}]  }
   0x1   :  { %v60_v0 = vld [vmem:[%s164_s0] sm:$0xff]  ;;  %v61_v1 = vld [vmem:[%s164_s0 + $0x8] sm:$0xff] }
   0x2   :  { %v72_v2 = vand.u32 2147483647, %v60_v0  ;;  %v73_v3 = vand.u32 2147483647, %v61_v1  ;;  %v126_v11 = vld [vmem:[%s165_s1] sm:$0xff]   ;;  %v66_v18 = vmax.f32 %v60_v0, 0.0 }
   0x3   :  { %v127_v14 = vunpack.c.l.bf16 %v126_v11  ;;  %v128_v16 = vunpack.c.h.bf16 %v126_v11  ;;  %v67_v22 = vmax.f32 %v61_v1, 0.0 }
   0x4   :  { %v74_v4 = vsub.f32 0.0, %v72_v2  ;;  %v75_v5 = vsub.f32 0.0, %v73_v3 }
   0x5   :  { %v68_v19 = vmul.f32 %v127_v14, %v60_v0  ;;  %v69_v23 = vmul.f32 %v128_v16, %v61_v1 }
   0x6   :  { %v76_v6 = vmul.f32 1.442695, %v74_v4  ;;  %v78_v7 = vmul.f32 1.442695, %v75_v5 }
   0x7   :  { %v70_v27 = vsub.f32 %v66_v18, %v68_v19  ;;  %v71_v30 = vsub.f32 %v67_v22, %v69_v23 }
   0x8   :  { %129 = vpow2.f32 %v76_v6 }
   0x9   :  { %131 = vpow2.f32 %v78_v7 }
  0x12   :  { %v130_v8 = vpop.eup %129 }
  0x13   :  { %v132_v9 = vpop.eup %131  ;;  %v80_v10 = vadd.f32 1.0, %v130_v8  ;;  %v83_v13 = vmul.f32 -0.5, %v130_v8  ;;  %v86_v20 = vand.u32 2147483647, %v130_v8 }
  0x14   :  { %v89_v12 = vadd.f32 1.0, %v132_v9  ;;  %v92_v15 = vmul.f32 -0.5, %v132_v9  ;;  %v95_v24 = vand.u32 2147483647, %v132_v9 }
  0x15   :  { %133 = vlog2.f32 %v80_v10  ;;  %v84_v17 = vadd.f32 1.0, %v83_v13  ;;  %vm87_vm0 = vcmp.lt.f32.partialorder %v86_v20, 0.0004427343 }
  0x16   :  { %135 = vlog2.f32 %v89_v12  ;;  %v93_v21 = vadd.f32 1.0, %v92_v15  ;;  %vm96_vm1 = vcmp.lt.f32.partialorder %v95_v24, 0.0004427343 }
  0x17   :  { %v85_v25 = vmul.f32 %v130_v8, %v84_v17 }
  0x18   :  { %v94_v28 = vmul.f32 %v132_v9, %v93_v21 }
  0x1f   :  { %v134_v26 = vpop.eup %133 }
  0x20   :  { %v136_v29 = vpop.eup %135  ;;  %v82_v31 = vmul.f32 0.6931472, %v134_v26 }
  0x21   :  { %v91_v32 = vmul.f32 0.6931472, %v136_v29 }
  0x22   :  { %v88_v33 = vsel %vm87_vm0, %v85_v25, %v82_v31 }
  0x23   :  { %v97_v34 = vsel %vm96_vm1, %v94_v28, %v91_v32  ;;  %v98_v35 = vadd.f32 %v88_v33, %v70_v27 }
  0x24   :  { %v99_v36 = vadd.f32 %v97_v34, %v71_v30 }
  0x26   :  { %v101_v37 = vadd.f32 %v99_v36, %v98_v35 }
  0x28   :  { %108 = vst [vmem:[%s166_s2] sm:$0xff] %v101_v37 }

</bundles_post_ra>
